<compile_context>
chip_gen: v7x
topology: tpu7x:2x2x1
jax: 0.10.0
libtpu: 0.0.40
codegen_flags: <defaults>
</compile_context>

<pallas_src>
import jax
import jax.numpy as jnp
from jax.experimental import pallas as pl
from jax.experimental.pallas import tpu as pltpu


LATENT = 16
HIDDEN = 128
OUT = 28 * 28          # 784 (logical output width)
OUT_PAD = 896          # 7 * 128, lane-dense padded output width
MAX_BLOCK_B = 1024     # batch-tile cap (VMEM-safe on v7x, good MXU occupancy)


def _round_up(x, m):
    return ((x + m - 1) // m) * m


def _decoder_kernel(x_ref, w1_ref, b1_ref, w2_ref, b2_ref, out_ref):
    # x_ref: (TB, 48) = [sigma | mu | noise], f32
    x = x_ref[...]
    sigma = x[:, 0:LATENT]
    mu = x[:, LATENT:2 * LATENT]
    noise = x[:, 2 * LATENT:3 * LATENT]

    # Reparameterization: feature = noise * exp(0.5 * sigma) + mu   (VPU/EUP, f32)
    feature = noise * jnp.exp(0.5 * sigma) + mu

    # Linear(16 -> 128) + ReLU   (MXU bf16 in / f32 accumulate, VPU)
    h = jnp.dot(feature.astype(jnp.bfloat16), w1_ref[...],
                preferred_element_type=jnp.float32)
    h = jnp.maximum(h + b1_ref[...], 0.0)

    # Linear(128 -> 896 padded) + Sigmoid   (MXU bf16 in / f32 acc, EUP tanh)
    logits = jnp.dot(h.astype(jnp.bfloat16), w2_ref[...],
                     preferred_element_type=jnp.float32)
    logits = logits + b2_ref[...]
    # sigmoid(x) == 0.5 * tanh(0.5 * x) + 0.5  -> single EUP transcendental
    out_ref[...] = (0.5 * jnp.tanh(0.5 * logits) + 0.5).astype(out_ref.dtype)


def decoder_forward(sigma, mu, noise, params, *, block_b=MAX_BLOCK_B):
    """sigma, mu, noise: (B, 16) float32. Returns (B, 784) float32."""
    w1, b1, w2, b2 = params   # w1 bf16 (16,128), b1 f32 (1,128),
                              # w2 bf16 (128,896), b2 f32 (1,896)
    B = sigma.shape[0]

    # Batch tile: at least 8 rows (f32 sublane), at most MAX_BLOCK_B.
    tb = min(block_b, _round_up(B, 8))
    b_pad = _round_up(B, tb)
    nb = b_pad // tb

    # Pack the three (B,16) latents into one (B,48) slab -> single DMA per tile.
    x = jnp.concatenate([sigma, mu, noise], axis=1)
    if b_pad != B:
        x = jnp.pad(x, ((0, b_pad - B), (0, 0)))

    cost = pl.CostEstimate(
        flops=2 * B * (LATENT * HIDDEN + HIDDEN * OUT),
        transcendentals=B * (LATENT + OUT),
        bytes_accessed=(B * 3 * LATENT * 4            # packed latents in
                        + B * OUT_PAD * 4             # output out
                        + LATENT * HIDDEN * 2         # w1 (bf16)
                        + HIDDEN * OUT_PAD * 2        # w2 (bf16)
                        + HIDDEN * 4 + OUT_PAD * 4),  # biases (f32)
    )

    out = pl.pallas_call(
        _decoder_kernel,
        out_shape=jax.ShapeDtypeStruct((b_pad, OUT_PAD), jnp.float32),
        grid=(nb,),
        in_specs=[
            pl.BlockSpec((tb, 3 * LATENT), lambda i: (i, 0)),      # packed latents
            pl.BlockSpec((LATENT, HIDDEN), lambda i: (0, 0)),      # w1 (resident)
            pl.BlockSpec((1, HIDDEN), lambda i: (0, 0)),           # b1 (resident)
            pl.BlockSpec((HIDDEN, OUT_PAD), lambda i: (0, 0)),     # w2 (resident)
            pl.BlockSpec((1, OUT_PAD), lambda i: (0, 0)),          # b2 (resident)
        ],
        out_specs=pl.BlockSpec((tb, OUT_PAD), lambda i: (i, 0)),
        compiler_params=pltpu.CompilerParams(
            dimension_semantics=("parallel",),
        ),
        cost_estimate=cost,
    )(x, w1, b1, w2, b2)

    # Strip batch padding and the zero-padded output columns.
    return out[:B, :OUT]


def init_params(key):
    """Init mirroring nn.Linear default: U(-1/sqrt(fan_in), 1/sqrt(fan_in)).

    Weights are stored bf16 (MXU inputs); biases stay f32 (added post-accum).
    w2/b2 are zero-padded from 784 -> 896 columns (lane-dense output)."""
    k1, k2, k3, k4 = jax.random.split(key, 4)
    bound1 = 1.0 / jnp.sqrt(LATENT)
    bound2 = 1.0 / jnp.sqrt(HIDDEN)
    w1 = jax.random.uniform(k1, (LATENT, HIDDEN), jnp.float32, -bound1, bound1)
    b1 = jax.random.uniform(k2, (1, HIDDEN), jnp.float32, -bound1, bound1)
    w2 = jax.random.uniform(k3, (HIDDEN, OUT), jnp.float32, -bound2, bound2)
    b2 = jax.random.uniform(k4, (1, OUT), jnp.float32, -bound2, bound2)
    # Pad output dim to 896 with zeros so padded columns contribute nothing.
    w2 = jnp.pad(w2, ((0, 0), (0, OUT_PAD - OUT)))
    b2 = jnp.pad(b2, ((0, 0), (0, OUT_PAD - OUT)))
    return (w1.astype(jnp.bfloat16), b1,
            w2.astype(jnp.bfloat16), b2)


def reference_forward(sigma, mu, noise, params):
    """Pure-JAX reference mirroring the kernel's numerics (bf16 MXU, f32 acc)."""
    w1, b1, w2, b2 = params
    feature = noise * jnp.exp(0.5 * sigma) + mu
    h = jnp.dot(feature.astype(jnp.bfloat16), w1,
                preferred_element_type=jnp.float32) + b1
    h = jnp.maximum(h, 0.0)
    logits = jnp.dot(h.astype(jnp.bfloat16), w2,
                     preferred_element_type=jnp.float32) + b2
    return jax.nn.sigmoid(logits)[:, :OUT]


if __name__ == "__main__":
    key = jax.random.PRNGKey(0)
    k_param, k_sigma, k_mu, k_noise = jax.random.split(key, 4)

    B = 8
    params = init_params(k_param)
    sigma = jax.random.normal(k_sigma, (B, LATENT), jnp.float32)
    mu = jax.random.normal(k_mu, (B, LATENT), jnp.float32)
    # TODO(synk): torch.randn_like(sigma) is non-deterministic; the noise is
    # sampled deterministically outside the kernel and passed in.
    noise = jax.random.normal(k_noise, (B, LATENT), jnp.float32)

    out = decoder_forward(sigma, mu, noise, params)
    out = jax.block_until_ready(out)

    ref = reference_forward(sigma, mu, noise, params)
    assert out.shape == (B, OUT), out.shape
    err = float(jnp.max(jnp.abs(out - ref)))
    assert jnp.allclose(out, ref, atol=1e-4, rtol=1e-4), err

    print("KERNEL_OK")
</pallas_src>

<mosaic_0001>
module attributes {stable_mosaic.version = 11 : i64} {
  func.func @_decoder_kernel(%arg0: i32, %arg1: memref<8x48xf32, #tpu.memory_space<vmem>>, %arg2: memref<16x128xbf16, #tpu.memory_space<vmem>>, %arg3: memref<1x128xf32, #tpu.memory_space<vmem>>, %arg4: memref<128x896xbf16, #tpu.memory_space<vmem>>, %arg5: memref<1x896xf32, #tpu.memory_space<vmem>>, %arg6: memref<8x896xf32, #tpu.memory_space<vmem>>) attributes {dimension_semantics = [#tpu.dimension_semantics<parallel>], iteration_bounds = array<i64: 1>, scalar_prefetch = 0 : i64, scratch_operands = 0 : i64, tpu.core_type = #tpu.core_type<tc>, window_params = [{transform_indices = @transform_0, window_bounds = array<i64: 8, 48>}, {pipeline_mode = #tpu.pipeline_mode<synchronous>, transform_indices = @transform_1, window_bounds = array<i64: 16, 128>}, {pipeline_mode = #tpu.pipeline_mode<synchronous>, transform_indices = @transform_2, window_bounds = array<i64: 1, 128>}, {pipeline_mode = #tpu.pipeline_mode<synchronous>, transform_indices = @transform_3, window_bounds = array<i64: 128, 896>}, {pipeline_mode = #tpu.pipeline_mode<synchronous>, transform_indices = @transform_4, window_bounds = array<i64: 1, 896>}, {transform_indices = @transform_5, window_bounds = array<i64: 8, 896>}]} {
    %c0 = arith.constant 0 : index
    %c0_0 = arith.constant 0 : index
    %0 = vector.load %arg1[%c0, %c0_0] : memref<8x48xf32, #tpu.memory_space<vmem>>, vector<8x48xf32>
    %1 = vector.extract_strided_slice %0 {offsets = [0, 0], sizes = [8, 16], strides = [1, 1]} : vector<8x48xf32> to vector<8x16xf32>
    %2 = vector.extract_strided_slice %0 {offsets = [0, 16], sizes = [8, 16], strides = [1, 1]} : vector<8x48xf32> to vector<8x16xf32>
    %3 = vector.extract_strided_slice %0 {offsets = [0, 32], sizes = [8, 16], strides = [1, 1]} : vector<8x48xf32> to vector<8x16xf32>
    %cst = arith.constant 5.000000e-01 : f32
    %4 = vector.broadcast %cst : f32 to vector<8x16xf32>
    %5 = arith.mulf %4, %1 : vector<8x16xf32>
    %6 = math.exp %5 : vector<8x16xf32>
    %7 = arith.mulf %3, %6 : vector<8x16xf32>
    %8 = arith.addf %7, %2 : vector<8x16xf32>
    %9 = arith.truncf %8 : vector<8x16xf32> to vector<8x16xbf16>
    %c0_1 = arith.constant 0 : index
    %c0_2 = arith.constant 0 : index
    %10 = vector.load %arg2[%c0_1, %c0_2] : memref<16x128xbf16, #tpu.memory_space<vmem>>, vector<16x128xbf16>
    %cst_3 = arith.constant dense<0.000000e+00> : vector<8x128xf32>
    %11 = tpu.matmul %9, %10, %cst_3 {dimension_numbers = #tpu.dot_dimension_numbers<[1], [0], [0], [1], [0, 0, 1, 1], [], []>} : vector<8x16xbf16>, vector<16x128xbf16>, vector<8x128xf32> -> vector<8x128xf32>
    %c0_4 = arith.constant 0 : index
    %c0_5 = arith.constant 0 : index
    %12 = vector.load %arg3[%c0_4, %c0_5] : memref<1x128xf32, #tpu.memory_space<vmem>>, vector<1x128xf32>
    %13 = vector.broadcast %12 : vector<1x128xf32> to vector<8x128xf32>
    %14 = arith.addf %11, %13 : vector<8x128xf32>
    %cst_6 = arith.constant 0.000000e+00 : f32
    %15 = vector.broadcast %cst_6 : f32 to vector<8x128xf32>
    %16 = arith.maximumf %14, %15 : vector<8x128xf32>
    %17 = arith.truncf %16 : vector<8x128xf32> to vector<8x128xbf16>
    %c0_7 = arith.constant 0 : index
    %c0_8 = arith.constant 0 : index
    %18 = vector.load %arg4[%c0_7, %c0_8] : memref<128x896xbf16, #tpu.memory_space<vmem>>, vector<128x896xbf16>
    %cst_9 = arith.constant dense<0.000000e+00> : vector<8x896xf32>
    %19 = tpu.matmul %17, %18, %cst_9 {dimension_numbers = #tpu.dot_dimension_numbers<[1], [0], [0], [1], [0, 0, 1, 1], [], []>} : vector<8x128xbf16>, vector<128x896xbf16>, vector<8x896xf32> -> vector<8x896xf32>
    %c0_10 = arith.constant 0 : index
    %c0_11 = arith.constant 0 : index
    %20 = vector.load %arg5[%c0_10, %c0_11] : memref<1x896xf32, #tpu.memory_space<vmem>>, vector<1x896xf32>
    %21 = vector.broadcast %20 : vector<1x896xf32> to vector<8x896xf32>
    %22 = arith.addf %19, %21 : vector<8x896xf32>
    %cst_12 = arith.constant 5.000000e-01 : f32
    %23 = vector.broadcast %cst_12 : f32 to vector<8x896xf32>
    %24 = arith.mulf %23, %22 : vector<8x896xf32>
    %25 = math.tanh %24 : vector<8x896xf32>
    %cst_13 = arith.constant 5.000000e-01 : f32
    %26 = vector.broadcast %cst_13 : f32 to vector<8x896xf32>
    %27 = arith.mulf %26, %25 : vector<8x896xf32>
    %cst_14 = arith.constant 5.000000e-01 : f32
    %28 = vector.broadcast %cst_14 : f32 to vector<8x896xf32>
    %29 = arith.addf %27, %28 : vector<8x896xf32>
    %c0_15 = arith.constant 0 : index
    %c0_16 = arith.constant 0 : index
    %30 = vector.load %arg6[%c0_15, %c0_16] : memref<8x896xf32, #tpu.memory_space<vmem>>, vector<8x896xf32>
    tpu.vector_store %arg6[%c0_15, %c0_16], %29 {strides = array<i32>} : memref<8x896xf32, #tpu.memory_space<vmem>>, vector<8x896xf32>,
    return
  }
  func.func @transform_0(%arg0: i32) -> (i32, i32) {
    %c0_i32 = arith.constant 0 : i32
    %c0_i32_0 = arith.constant 0 : i32
    return %arg0, %c0_i32 : i32, i32
  }
  func.func @transform_1(%arg0: i32) -> (i32, i32) {
    %c0_i32 = arith.constant 0 : i32
    %c0_i32_0 = arith.constant 0 : i32
    %c0_i32_1 = arith.constant 0 : i32
    return %c0_i32, %c0_i32_0 : i32, i32
  }
  func.func @transform_2(%arg0: i32) -> (i32, i32) {
    %c0_i32 = arith.constant 0 : i32
    %c0_i32_0 = arith.constant 0 : i32
    %c0_i32_1 = arith.constant 0 : i32
    return %c0_i32, %c0_i32_0 : i32, i32
  }
  func.func @transform_3(%arg0: i32) -> (i32, i32) {
    %c0_i32 = arith.constant 0 : i32
    %c0_i32_0 = arith.constant 0 : i32
    %c0_i32_1 = arith.constant 0 : i32
    return %c0_i32, %c0_i32_0 : i32, i32
  }
  func.func @transform_4(%arg0: i32) -> (i32, i32) {
    %c0_i32 = arith.constant 0 : i32
    %c0_i32_0 = arith.constant 0 : i32
    %c0_i32_1 = arith.constant 0 : i32
    return %c0_i32, %c0_i32_0 : i32, i32
  }
  func.func @transform_5(%arg0: i32) -> (i32, i32) {
    %c0_i32 = arith.constant 0 : i32
    %c0_i32_0 = arith.constant 0 : i32
    return %arg0, %c0_i32 : i32, i32
  }
}

</mosaic_0001>

<bundles_post_ra>
// kernel: tpu_custom_call.1
= control target key start
LH: loop header
LB: loop body
LE: loop exit
PB: predicated region body
PF: predicated region fallthrough
CT: control target
= control target key end

     0   :  { %10 = vsyncpa [#allocation3], 0  ;;  %s1155_s0 = inlined_call_operand.hbm [shape: f32[8,48], index: 0, kind: input, shape index: {}]   ;;  %s1156_s1 = inlined_call_operand.hbm [shape: bf16[16,128], index: 1, kind: input, shape index: {}]   ;;  %s1157_s2 = inlined_call_operand.vmem [shape: f32[1,128], index: 2, kind: input, shape index: {}]   ;;  %s1158_s3 = inlined_call_operand.hbm [shape: bf16[128,896], index: 3, kind: input, shape index: {}]   ;;  %s1159_s4 = inlined_call_operand.vmem [shape: f32[1,896], index: 4, kind: input, shape index: {}]   ;;  %s1160_s5 = inlined_call_operand.hbm [shape: f32[8,896], index: 5, kind: output, shape index: {}]  }
   0x1   :  { %11 = vsyncpa [#allocation6], 0 }
   0x2   :  { %12 = vsyncpa [#allocation4], 0  ;;  %s1044_s18 = smov [#allocation5]   ;;  %s950_s22 = scalar_lea.hbm %s1156_s1, 128 }
   0x3   :  { %s28_s19 = sshll.u32 %s1044_s18, 4  ;;  %p951_p0 = scmp.ne.s32.totalorder %s1156_s1, %s950_s22  ;;  %s29_s19 = int_to_ptr.vmem [resolvable:$true] %s28_s19 }
   0x4   :  { %p954_p1 = scmp.lt.u32.totalorder %s950_s22, %s1156_s1 }
   0x6   :  { %p956_p2 = pnand %p954_p1, %p951_p0 }
   0x8   :  { %959 = shalt.err (!%p956_p2)
}
   0x9   :  { %s960_s27 = scalar_lea.vmem %s29_s19, 128  ;;  %p965_p4 = scmp.lt.s32.totalorder %s29_s19, %s29_s19 }
   0xa   :  { %p961_p3 = scmp.ne.s32.totalorder %s29_s19, %s960_s27  ;;  %p966_p5 = scmp.lt.s32.totalorder %s960_s27, %s960_s27 }
   0xc   :  { %p967_p6 = por %p966_p5, %p965_p4 }
   0xe   :  { %p968_p7 = pnand %p967_p6, %p961_p3 }
  0x10   :  { %971 = shalt.err (!%p968_p7)
}
  0x11   :  { %s1045_s28 = smov 64   ;;  %s1046_s29 = smov 4  }
  0x12   :  { %34 = dma.hbm_to_vmem [thread:$0]  %s1156_s1, 128, %s29_s19, [#allocation6], %s1045_s28, %s1045_s28, %s1046_s29  }
  0x13   :  { %s1047_s7 = smov [#allocation2]   ;;  %s1048_s9 = smov [#allocation7]  }
  0x14   :  { %s19_s8 = sshll.u32 %s1047_s7, 4  ;;  %s42_s10 = sshll.u32 %s1048_s9, 4  ;;  %s20_s8 = int_to_ptr.vmem [resolvable:$true] %s19_s8  ;;  %s43_s10 = int_to_ptr.vmem [resolvable:$true] %s42_s10 }
  0x15   :  { %s972_s13 = scalar_lea.hbm %s1155_s0, 128 }
  0x16   :  { %p973_p8 = scmp.ne.s32.totalorder %s1155_s0, %s972_s13  ;;  %p976_p9 = scmp.lt.u32.totalorder %s972_s13, %s1155_s0 }
  0x18   :  { %p978_p10 = pnand %p976_p9, %p973_p8 }
  0x1a   :  { %981 = shalt.err (!%p978_p10)
}
  0x1b   :  { %s982_s1 = scalar_lea.vmem %s20_s8, 128  ;;  %p987_p12 = scmp.lt.s32.totalorder %s20_s8, %s20_s8 }
  0x1c   :  { %p983_p11 = scmp.ne.s32.totalorder %s20_s8, %s982_s1  ;;  %p988_p13 = scmp.lt.s32.totalorder %s982_s1, %s982_s1 }
  0x1e   :  { %p989_p0 = por %p988_p13, %p987_p12 }
  0x20   :  { %p990_p1 = pnand %p989_p0, %p983_p11 }
  0x22   :  { %993 = shalt.err (!%p990_p1)
}
  0x23   :  { %22 = dma.hbm_to_vmem [thread:$0]  %s1155_s0, 128, %s20_s8, [#allocation3]  }
  0x24   :  { %s994_s22 = scalar_lea.hbm %s1158_s3, 7168 }
  0x25   :  { %p995_p2 = scmp.ne.s32.totalorder %s1158_s3, %s994_s22  ;;  %p998_p3 = scmp.lt.u32.totalorder %s994_s22, %s1158_s3 }
  0x27   :  { %p1000_p4 = pnand %p998_p3, %p995_p2 }
  0x29   :  { %1003 = shalt.err (!%p1000_p4)
}
  0x2a   :  { %s1004_s27 = scalar_lea.vmem %s43_s10, 7168  ;;  %p1009_p6 = scmp.lt.s32.totalorder %s43_s10, %s43_s10 }
  0x2b   :  { %p1005_p5 = scmp.ne.s32.totalorder %s43_s10, %s1004_s27  ;;  %p1010_p7 = scmp.lt.s32.totalorder %s1004_s27, %s1004_s27 }
  0x2d   :  { %p1011_p8 = por %p1010_p7, %p1009_p6 }
  0x2f   :  { %p1012_p9 = pnand %p1011_p8, %p1005_p5 }
  0x31   :  { %1015 = shalt.err (!%p1012_p9)
}
  0x32   :  { %s1049_s0 = smov 448   ;;  %s1050_s28 = smov 28  }
  0x33   :  { %48 = dma.hbm_to_vmem [thread:$0]  %s1158_s3, 7168, %s43_s10, [#allocation6], %s1049_s0, %s1049_s0, %s1050_s28  }
  0x34   :  { %1038 = dma.done.wait [#allocation3], 128  }
  0x35   :  { %1039 = vsyncadd [#allocation3], 4294967168 }
  0x36   :  { %1040 = dma.done.wait [#allocation6], 7296  }
  0x37   :  { %1041 = vsyncadd [#allocation6], 4294960000  ;;  %v61_v0 = vld [vmem:[#allocation2] sm:$0xff]  ;;  %v853_v3 = vld [vmem:[#allocation5] sm:$0xff]   ;;  %v1051_v4 = vmov 0.0   ;;  %vm1052_vm0 = vmmov 0  }
  0x38   :  { %v62_v1 = vmul.f32 0.5, %v61_v0  ;;  %813 = vmatprep.subr.bf16.mxu0 %v1051_v4  ;;  %815 = vmatprep.mubr.msk.bf16.mxu0 %vm1052_vm0, %v1051_v4  ;;  %s1053_s6 = smov 32   ;;  %s1054_s3 = smov 16   ;;  %v854_v6 = vld [vmem:[#allocation7 + $0x4] ss:$28 sps:$4 sm:$0xff]   ;;  %vm94_vm1 = vcmask 130048  }
  0x39   :  { %814 = vmatpush3.bf16.msra.mxu0 %v853_v3  ;;  %v858_v7 = vld [vmem:[#allocation7 + $0xc] ss:$28 sps:$4 sm:$0xff]   ;;  %v859_v8 = vld [vmem:[#allocation7] ss:$28 sps:$4 sm:$0xff]   ;;  %529 = vmatprep.subr.bf16.mxu1 %v854_v6  ;;  %v865_v10 = vld [vmem:[#allocation7 + $0x38] ss:$28 sps:$4 sm:$0xff]  }
  0x3a   :  { %v63_v2 = vmul.f32 1.442695, %v62_v1  ;;  %v860_v9 = vld [vmem:[#allocation7 + $0x3c] ss:$28 sps:$4 sm:$0xff]   ;;  %570 = vmatprep.subr.bf16.mxu0 %v858_v7  ;;  %530 = vmatpush1.bf16.msra.mxu1 %v859_v8  ;;  %v866_v12 = vld [vmem:[#allocation7 + $0x74] ss:$28 sps:$4 sm:$0xff]  }
  0x3b   :  { %531 = vmatprep.subr.bf16.mxu1 %v860_v9  ;;  %v871_v14 = vld [vmem:[#allocation7 + $0x70] ss:$28 sps:$4 sm:$0xff]   ;;  %v877_v19 = vld [vmem:[#allocation7 + $0xa8] ss:$28 sps:$4 sm:$0xff]   ;;  %s1055_s7 = smov 96   ;;  %v1056_v45 = vmov 0  }
  0x3c   :  { %934 = vpow2.f32 %v63_v2  ;;  %v872_v17 = vld [vmem:[#allocation7 + $0xac] ss:$28 sps:$4 sm:$0xff]   ;;  %v878_v20 = vld [vmem:[#allocation7 + $0xe4] ss:$28 sps:$4 sm:$0xff]   ;;  %v884_v22 = vld [vmem:[#allocation7 + $0x11c] ss:$28 sps:$4 sm:$0xff]   ;;  %561 = vmatprep.mubr.bf16.mxu1 %v1056_v45 }
  0x3d   :  { %v883_v21 = vld [vmem:[#allocation7 + $0xe0] ss:$28 sps:$4 sm:$0xff]   ;;  %v889_v23 = vld [vmem:[#allocation7 + $0x118] ss:$28 sps:$4 sm:$0xff]   ;;  %v895_v25 = vld [vmem:[#allocation7 + $0x150] ss:$28 sps:$4 sm:$0xff]  }
  0x3e   :  { %532 = vmatpush1.bf16.msra.mxu1 %v865_v10  ;;  %v890_v24 = vld [vmem:[#allocation7 + $0x154] ss:$28 sps:$4 sm:$0xff]   ;;  %v856_v26 = vld [vmem:[#allocation7 + $0x8] ss:$28 sps:$4 sm:$0xff]   ;;  %v862_v29 = vld [vmem:[#allocation7 + $0x40] ss:$28 sps:$4 sm:$0xff]  }
  0x3f   :  { %533 = vmatprep.subr.bf16.mxu1 %v866_v12  ;;  %v864_v27 = vld [vmem:[#allocation7 + $0x44] ss:$28 sps:$4 sm:$0xff]   ;;  %v870_v30 = vld [vmem:[#allocation7 + $0x7c] ss:$28 sps:$4 sm:$0xff]   ;;  %v876_v32 = vld [vmem:[#allocation7 + $0xb4] ss:$28 sps:$4 sm:$0xff]  }
  0x40   :  { %v868_v31 = vld [vmem:[#allocation7 + $0x78] ss:$28 sps:$4 sm:$0xff]   ;;  %v874_v33 = vld [vmem:[#allocation7 + $0xb0] ss:$28 sps:$4 sm:$0xff]   ;;  %v880_v35 = vld [vmem:[#allocation7 + $0xe8] ss:$28 sps:$4 sm:$0xff]  }
  0x41   :  { %v882_v34 = vld [vmem:[#allocation7 + $0xec] ss:$28 sps:$4 sm:$0xff]   ;;  %v888_v36 = vld [vmem:[#allocation7 + $0x124] ss:$28 sps:$4 sm:$0xff]   ;;  %v894_v38 = vld [vmem:[#allocation7 + $0x15c] ss:$28 sps:$4 sm:$0xff]  }
  0x42   :  { %534 = vmatpush1.bf16.msra.mxu1 %v871_v14  ;;  %v886_v37 = vld [vmem:[#allocation7 + $0x120] ss:$28 sps:$4 sm:$0xff]   ;;  %v892_v39 = vld [vmem:[#allocation7 + $0x158] ss:$28 sps:$4 sm:$0xff]   ;;  %v896_v40 = vld [vmem:[#allocation7 + $0x18c] ss:$28 sps:$4 sm:$0xff]   ;;  %v206_v14 = vlaneseq }
  0x43   :  { %535 = vmatprep.subr.bf16.mxu1 %v872_v17  ;;  %v900_v41 = vld [vmem:[#allocation7 + $0x194] ss:$28 sps:$4 sm:$0xff]   ;;  %v901_v43 = vld [vmem:[#allocation7 + $0x188] ss:$28 sps:$4 sm:$0xff]   ;;  %v910_v60 = vld [vmem:[#allocation7 + $0x80] ss:$28 sps:$4 sm:$0xff]  }
  0x44   :  { %v898_v42 = vld [vmem:[#allocation7 + $0x190] ss:$28 sps:$4 sm:$0xff]   ;;  %v905_v54 = vld [vmem:[#allocation7 + $0x18] ss:$28 sps:$4 sm:$0xff]   ;;  %v906_v57 = vld [vmem:[#allocation7 + $0x48] ss:$28 sps:$4 sm:$0xff]  }
  0x45   :  { %v904_v44 = vld [vmem:[#allocation7 + $0x14] ss:$28 sps:$4 sm:$0xff]   ;;  %v908_v56 = vld [vmem:[#allocation7 + $0x4c] ss:$28 sps:$4 sm:$0xff]   ;;  %v912_v59 = vld [vmem:[#allocation7 + $0x84] ss:$28 sps:$4 sm:$0xff]  }
  0x46   :  { %v935_v5 = vpop.eup %934  ;;  %536 = vmatpush1.bf16.msra.mxu1 %v877_v19  ;;  %v743_v46 = vld [vmem:[%s1157_s2] ss:$0 sm:$0xff]  ;;  %v913_v61 = vld [vmem:[#allocation7 + $0x88] ss:$28 sps:$4 sm:$0xff]   ;;  %v916_v62 = vld [vmem:[#allocation7 + $0xbc] ss:$28 sps:$4 sm:$0xff]  }
  0x47   :  { %66 = vrot.lane.b32.xlu0 %v935_v5, %s1053_s6  ;;  %537 = vmatprep.subr.bf16.mxu1 %v878_v20  ;;  %v902_v53 = vld [vmem:[#allocation7 + $0x10] ss:$28 sps:$4 sm:$0xff]   ;;  %v914_v63 = vld [vmem:[#allocation7 + $0xb8] ss:$28 sps:$4 sm:$0xff]   ;;  %v922_v6 = vld [vmem:[#allocation7 + $0x128] ss:$28 sps:$4 sm:$0xff]  }
  0x48   :  { %v909_v58 = vld [vmem:[#allocation7 + $0x50] ss:$28 sps:$4 sm:$0xff]   ;;  %v921_v3 = vld [vmem:[#allocation7 + $0xf8] ss:$28 sps:$4 sm:$0xff]   ;;  %v928_v8 = vld [vmem:[#allocation7 + $0x164] ss:$28 sps:$4 sm:$0xff]  }
  0x49   :  { %v920_v1 = vld [vmem:[#allocation7 + $0xf4] ss:$28 sps:$4 sm:$0xff]   ;;  %v924_v5 = vld [vmem:[#allocation7 + $0x12c] ss:$28 sps:$4 sm:$0xff]   ;;  %v926_v9 = vld [vmem:[#allocation7 + $0x160] ss:$28 sps:$4 sm:$0xff]  }
  0x4a   :  { %538 = vmatpush1.bf16.msra.mxu1 %v883_v21  ;;  %v918_v2 = vld [vmem:[#allocation7 + $0xf0] ss:$28 sps:$4 sm:$0xff]   ;;  %v929_v10 = vld [vmem:[#allocation7 + $0x168] ss:$28 sps:$4 sm:$0xff]   ;;  %v930_v12 = vld [vmem:[#allocation7 + $0x198] ss:$28 sps:$4 sm:$0xff]  }
  0x4b   :  { %71 = vrot.lane.b32.xlu0 %v61_v0, %s1054_s3  ;;  %539 = vmatprep.subr.bf16.mxu1 %v884_v22  ;;  %v925_v7 = vld [vmem:[#allocation7 + $0x130] ss:$28 sps:$4 sm:$0xff]  }
  0x4e   :  { %540 = vmatpush1.bf16.msra.mxu1 %v889_v23 }
  0x4f   :  { %541 = vmatprep.subr.bf16.mxu1 %v890_v24 }
  0x52   :  { %542 = vmatpush1.bf16.msra.mxu1 %v895_v25 }
  0x53   :  { %543 = vmatprep.subr.bf16.mxu1 %v896_v40 }
  0x56   :  { %544 = vmatpush1.bf16.msra.mxu1 %v901_v43 }
  0x57   :  { %611 = vmatprep.subr.bf16.mxu1 %v904_v44 }
  0xb9   :  { %v67_v11 = vpop.permute.xlu0 %66 }
  0xba   :  { %v69_v13 = vmul.f32 %v67_v11, %v61_v0  ;;  %v917_v0 = vld [vmem:[#allocation7 + $0xc0] ss:$28 sps:$4 sm:$0xff]  }
  0xbb   :  { %v932_v11 = vld [vmem:[#allocation7 + $0x19c] ss:$28 sps:$4 sm:$0xff]  }
  0xbd   :  { %v72_v15 = vpop.permute.xlu0 %71 }
  0xbe   :  { %v74_v16 = vadd.f32 %v72_v15, %v69_v13  ;;  %v933_v13 = vld [vmem:[#allocation7 + $0x1a0] ss:$28 sps:$4 sm:$0xff]   ;;  %v207_v15 = vshrl.u32 %v206_v14, 7 }
  0xc0   :  { %v75_v18 = vpack.c.bf16 %v74_v16, %v74_v16  ;;  %v208_v16 = vsub.s32 0, %v207_v15  ;;  %v216_v17 = vsub.s32 2, %v207_v15  ;;  %v212_v19 = vsub.s32 1, %v207_v15 }
  0xc1   :  { %v220_v20 = vsub.s32 3, %v207_v15 }
  0xc2   :  { %86 = vrot.lane.b32.xlu1 %v75_v18, %s1055_s7  ;;  %v204_v18 = vld [vmem:[%s1159_s4] sm:$0xff]  ;;  %s1057_s4 = smov [#allocation8]  }
  0xc3   :  { %v209_v21 = vrot.slane %v204_v18, %v208_v16  ;;  %v217_v22 = vrot.slane %v204_v18, %v216_v17  ;;  %v213_v23 = vrot.slane %v204_v18, %v212_v19  ;;  %v221_v24 = vrot.slane %v204_v18, %v220_v20  ;;  %s733_s11 = sshll.u32 %s1057_s4, 4  ;;  %s734_s11 = int_to_ptr.vmem [resolvable:$true] %s733_s11 }
  0xc4   :  { %s1016_s12 = scalar_lea.vmem %s734_s11, 896  ;;  %p1021_p11 = scmp.lt.s32.totalorder %s734_s11, %s734_s11 }
  0xc5   :  { %p1017_p10 = scmp.ne.s32.totalorder %s734_s11, %s1016_s12  ;;  %p1022_p12 = scmp.lt.s32.totalorder %s1016_s12, %s1016_s12 }
  0xc7   :  { %p1023_p13 = por %p1022_p12, %p1021_p11 }
  0xc9   :  { %p1024_p0 = pnand %p1023_p13, %p1017_p10 }
 0x134   :  { %v87_v28 = vpop.permute.xlu1 %86 }
 0x135   :  { %816 = vmatmul.mubr.msk.bf16.vlgmr.msra.gmra.mrb[0].mxu0 %vm94_vm1, %v87_v28 }
 0x136   :  { %571 = vmatpush1.bf16.msra.mxu0 %v856_v26  ;;  %602 = vmatprep.mubr.bf16.mxu0 %v1056_v45 }
 0x137   :  { %572 = vmatprep.subr.bf16.mxu0 %v864_v27 }
 0x13a   :  { %573 = vmatpush1.bf16.msra.mxu0 %v862_v29 }
 0x13b   :  { %574 = vmatprep.subr.bf16.mxu0 %v870_v30 }
 0x13e   :  { %575 = vmatpush1.bf16.msra.mxu0 %v868_v31 }
 0x13f   :  { %576 = vmatprep.subr.bf16.mxu0 %v876_v32 }
 0x142   :  { %577 = vmatpush1.bf16.msra.mxu0 %v874_v33 }
 0x143   :  { %578 = vmatprep.subr.bf16.mxu0 %v882_v34 }
 0x146   :  { %579 = vmatpush1.bf16.msra.mxu0 %v880_v35 }
 0x147   :  { %580 = vmatprep.subr.bf16.mxu0 %v888_v36 }
 0x14a   :  { %581 = vmatpush1.bf16.msra.mxu0 %v886_v37 }
 0x14b   :  { %582 = vmatprep.subr.bf16.mxu0 %v894_v38 }
 0x14e   :  { %583 = vmatpush1.bf16.msra.mxu0 %v892_v39 }
 0x14f   :  { %584 = vmatprep.subr.bf16.mxu0 %v900_v41 }
 0x152   :  { %585 = vmatpush1.bf16.msra.mxu0 %v898_v42 }
 0x153   :  { %819 = vmatprep.subr.bf16.mxu0 %v1051_v4 }
 0x208   :  { %v132_v47 = vpop.f32.mrb[0].mxu0 }
 0x209   :  { %v133_v48 = vadd.f32 %v743_v46, %v132_v47  ;;  %v817_v49 = vpop.f32.mrb[1].mxu0 }
 0x20a   :  { %v135_v50 = vpop.f32.mrb[2].mxu0 }
 0x20b   :  { %v138_v51 = vmax.f32 %v133_v48, 0.0  ;;  %v818_v52 = vpop.f32.mrb[3].mxu0 }
 0x20c   :  { %v224_v52 = vsub.s32 4, %v207_v15 }
 0x20d   :  { %v139_v55 = vpack.c.bf16 %v138_v51, %v138_v51 }
 0x20f   :  { %562 = vmatmul.mubr.bf16.vlgmr.msra.gmra.mrb[0].mxu1 %v139_v55  ;;  %603 = vmatmul.mubr.bf16.vlgmr.msra.gmra.mrb[4].mxu0 %v139_v55 }
 0x210   :  { %612 = vmatpush1.bf16.msra.mxu1 %v902_v53  ;;  %820 = vmatpush3.bf16.msra.mxu0 %v905_v54  ;;  %v232_v53 = vsub.s32 6, %v207_v15  ;;  %v228_v54 = vsub.s32 5, %v207_v15 }
 0x211   :  { %613 = vmatprep.subr.bf16.mxu1 %v908_v56  ;;  %821 = vmatprep.subr.bf16.mxu0 %v1051_v4 }
 0x212   :  { %643 = vmatprep.mubr.bf16.mxu1 %v1056_v45  ;;  %835 = vmatprep.mubr.msk.bf16.mxu0 %vm1052_vm0, %v1051_v4  ;;  %v233_v56 = vrot.slane %v204_v18, %v232_v53 }
 0x214   :  { %614 = vmatpush1.bf16.msra.mxu1 %v906_v57  ;;  %822 = vmatpush3.bf16.msra.mxu0 %v909_v58  ;;  %v229_v57 = vrot.slane %v204_v18, %v228_v54 }
 0x215   :  { %615 = vmatprep.subr.bf16.mxu1 %v912_v59  ;;  %823 = vmatprep.subr.bf16.mxu0 %v1051_v4 }
 0x218   :  { %616 = vmatpush1.bf16.msra.mxu1 %v910_v60  ;;  %824 = vmatpush3.bf16.msra.mxu0 %v913_v61 }
 0x219   :  { %617 = vmatprep.subr.bf16.mxu1 %v916_v62  ;;  %825 = vmatprep.subr.bf16.mxu0 %v1051_v4 }
 0x21c   :  { %618 = vmatpush1.bf16.msra.mxu1 %v914_v63  ;;  %826 = vmatpush3.bf16.msra.mxu0 %v917_v0 }
 0x21d   :  { %619 = vmatprep.subr.bf16.mxu1 %v920_v1  ;;  %827 = vmatprep.subr.bf16.mxu0 %v1051_v4 }
 0x220   :  { %620 = vmatpush1.bf16.msra.mxu1 %v918_v2  ;;  %828 = vmatpush3.bf16.msra.mxu0 %v921_v3 }
 0x221   :  { %621 = vmatprep.subr.bf16.mxu1 %v924_v5  ;;  %829 = vmatprep.subr.bf16.mxu0 %v1051_v4 }
 0x224   :  { %622 = vmatpush1.bf16.msra.mxu1 %v922_v6  ;;  %830 = vmatpush3.bf16.msra.mxu0 %v925_v7 }
 0x225   :  { %623 = vmatprep.subr.bf16.mxu1 %v928_v8  ;;  %831 = vmatprep.subr.bf16.mxu0 %v1051_v4 }
 0x228   :  { %624 = vmatpush1.bf16.msra.mxu1 %v926_v9  ;;  %832 = vmatpush3.bf16.msra.mxu0 %v929_v10 }
 0x229   :  { %625 = vmatprep.subr.bf16.mxu1 %v932_v11  ;;  %833 = vmatprep.subr.bf16.mxu0 %v1051_v4 }
 0x22c   :  { %626 = vmatpush1.bf16.msra.mxu1 %v930_v12  ;;  %834 = vmatpush3.bf16.msra.mxu0 %v933_v13 }
 0x22f   :  { %644 = vmatmul.mubr.bf16.vlgmr.msra.gmra.mrb[4].mxu1 %v139_v55  ;;  %836 = vmatmul.mubr.bf16.vlgmr.msra.gmra.mrb[8].mxu0 %v139_v55  ;;  %v225_v55 = vrot.slane %v204_v18, %v224_v52 }
 0x2e2   :  { %v563_v25 = vpop.f32.mrb[0].mxu1  ;;  %v604_v4 = vpop.f32.mrb[4].mxu0 }
 0x2e3   :  { %v564_v26 = vadd.f32 %v563_v25, %v209_v21  ;;  %v605_v27 = vadd.f32 %v604_v4, %v217_v22  ;;  %v565_v28 = vpop.f32.mrb[1].mxu1  ;;  %v606_v29 = vpop.f32.mrb[5].mxu0 }
 0x2e4   :  { %v566_v30 = vadd.f32 %v565_v28, %v213_v23  ;;  %v607_v31 = vadd.f32 %v606_v29, %v221_v24  ;;  %v567_v32 = vpop.f32.mrb[2].mxu1  ;;  %v608_v33 = vpop.f32.mrb[6].mxu0 }
 0x2e5   :  { %v692_v34 = vmul.f32 0.5, %v564_v26  ;;  %v694_v35 = vmul.f32 0.5, %v605_v27  ;;  %v568_v36 = vpop.f32.mrb[3].mxu1  ;;  %v609_v37 = vpop.f32.mrb[7].mxu0 }
 0x2e6   :  { %v693_v38 = vmul.f32 0.5, %v566_v30  ;;  %v695_v39 = vmul.f32 0.5, %v607_v31 }
 0x2e7   :  { %936 = vtanh.f32 %v692_v34 }
 0x2e8   :  { %938 = vtanh.f32 %v694_v35 }
 0x2e9   :  { %940 = vtanh.f32 %v693_v38 }
 0x2ea   :  { %942 = vtanh.f32 %v695_v39 }
 0x2f1   :  { %v937_v40 = vpop.eup %936 }
 0x2f2   :  { %v939_v41 = vpop.eup %938  ;;  %v706_v42 = vmul.f32 0.5, %v937_v40 }
 0x2f3   :  { %v941_v43 = vpop.eup %940  ;;  %v708_v44 = vmul.f32 0.5, %v939_v41 }
 0x2f4   :  { %v943_v45 = vpop.eup %942  ;;  %v713_v46 = vadd.f32 0.5, %v706_v42  ;;  %v707_v47 = vmul.f32 0.5, %v941_v43 }
 0x2f5   :  { %v715_v48 = vadd.f32 0.5, %v708_v44  ;;  %v709_v49 = vmul.f32 0.5, %v943_v45 }
 0x2f6   :  { %720 = vst [vmem:[#allocation8] sm:$0xff] %v713_v46  ;;  %v714_v50 = vadd.f32 0.5, %v707_v47 }
 0x2f7   :  { %722 = vst [vmem:[#allocation8 + $0x10] sm:$0xff] %v715_v48  ;;  %v716_v51 = vadd.f32 0.5, %v709_v49 }
 0x2f8   :  { %721 = vst [vmem:[#allocation8 + $0x8] sm:$0xff] %v714_v50 }
 0x2f9   :  { %723 = vst [vmem:[#allocation8 + $0x18] sm:$0xff] %v716_v51 }
 0x302   :  { %v645_v58 = vpop.f32.mrb[4].mxu1  ;;  %v686_v59 = vpop.f32.mrb[8].mxu0 }
 0x303   :  { %v646_v60 = vadd.f32 %v645_v58, %v225_v55  ;;  %v687_v61 = vadd.f32 %v686_v59, %v233_v56  ;;  %v647_v62 = vpop.f32.mrb[5].mxu1  ;;  %v837_v63 = vpop.f32.mrb[9].mxu0 }
 0x304   :  { %v648_v0 = vadd.f32 %v647_v62, %v229_v57  ;;  %v649_v1 = vpop.f32.mrb[6].mxu1  ;;  %v689_v2 = vpop.f32.mrb[10].mxu0 }
 0x305   :  { %v696_v3 = vmul.f32 0.5, %v646_v60  ;;  %v698_v5 = vmul.f32 0.5, %v687_v61  ;;  %v650_v6 = vpop.f32.mrb[7].mxu1  ;;  %v838_v7 = vpop.f32.mrb[11].mxu0 }
 0x306   :  { %v697_v8 = vmul.f32 0.5, %v648_v0 }
 0x307   :  { %944 = vtanh.f32 %v696_v3 }
 0x308   :  { %946 = vtanh.f32 %v698_v5 }
 0x309   :  { %948 = vtanh.f32 %v697_v8 }
 0x311   :  { %v945_v9 = vpop.eup %944 }
 0x312   :  { %v947_v10 = vpop.eup %946  ;;  %v710_v11 = vmul.f32 0.5, %v945_v9 }
 0x313   :  { %v949_v12 = vpop.eup %948  ;;  %v712_v13 = vmul.f32 0.5, %v947_v10 }
 0x314   :  { %v717_v14 = vadd.f32 0.5, %v710_v11  ;;  %v711_v15 = vmul.f32 0.5, %v949_v12 }
 0x315   :  { %v719_v16 = vadd.f32 0.5, %v712_v13 }
 0x316   :  { %724 = vst [vmem:[#allocation8 + $0x20] sm:$0xff] %v717_v14  ;;  %v718_v17 = vadd.f32 0.5, %v711_v15 }
 0x317   :  { %726 = vst [vmem:[#allocation8 + $0x30] sm:$0xff] %v719_v16 }
 0x318   :  { %725 = vst [vmem:[#allocation8 + $0x28] sm:$0xff] %v718_v17 }
 0x319   :  { %1027 = shalt.err (!%p1024_p0)
}
 0x31a   :  { %s1028_s15 = scalar_lea.hbm %s1160_s5, 896 }
 0x31b   :  { %p1029_p1 = scmp.ne.s32.totalorder %s1160_s5, %s1028_s15  ;;  %p1032_p2 = scmp.lt.u32.totalorder %s1028_s15, %s1160_s5 }
 0x31d   :  { %p1034_p3 = pnand %p1032_p2, %p1029_p1 }
 0x31f   :  { %1037 = shalt.err (!%p1034_p3)
}
 0x320   :  { %736 = dma.vmem_to_hbm [thread:$0]  %s734_s11, 896, %s1160_s5, [#allocation4]  }
 0x321   :  { %1042 = dma.done.wait [#allocation4], 896  }
 0x322   :  { %1043 = vsyncadd [#allocation4], 4294966400 }
 0x323   :  { %740 = vsyncpa [#allocation3], 1 }
 0x324   :  { %741 = vsyncpa [#allocation6], 1 }
 0x325   :  { %742 = vsyncpa [#allocation4], 1 }

</bundles_post_ra>
